<compile_context>
chip_gen: v6e
topology: v6e:2x2x1
jax: 0.10.0
libtpu: 0.0.40
codegen_flags: <defaults>
</compile_context>

<pallas_src>
import jax
import jax.numpy as jnp
from jax.experimental import pallas as pl
from jax.experimental.pallas import tpu as pltpu

_LANE = 128
_SUBLANE = 8
_MIN_GRID_STEPS = 4          # keep the pipeline (and both v7x TCs) busy
_VMEM_LIMIT_BYTES = 32 * 1024 * 1024


def _swish_kernel(x_ref, o_ref):
    x = x_ref[...]
    # Keep f32/bf16 native; upcast narrower floats. Compute (EUP sigmoid +
    # VPU mul) is fully hidden behind HBM DMA for this elementwise kernel.
    if x.dtype == jnp.float32 or x.dtype == jnp.bfloat16:
        y = x * jax.nn.sigmoid(x)
    else:
        xf = x.astype(jnp.float32)
        y = xf * jax.nn.sigmoid(xf)
    o_ref[...] = y.astype(o_ref.dtype)


def _vmem_capacity_bytes():
    """Physical VMEM per TensorCore (64 MiB on v7x, 128 MiB on v5e/v6e)."""
    try:
        cap = getattr(pltpu.get_tpu_info(), "vmem_capacity_bytes", None)
        if cap:
            return int(cap)
    except Exception:
        pass
    return 128 * 1024 * 1024


def _target_block_bytes():
    # 2x input + 2x output double buffers; keep their total <= ~1/4 of
    # physical VMEM (and under the 32 MiB scoped limit we request).
    #   v7x (64 MiB):   4 MiB blocks -> 16 MiB of buffers.
    #   v5e/v6e (128):  4 MiB blocks -> 16 MiB of buffers.
    return min(4 * 1024 * 1024, _vmem_capacity_bytes() // 16)


def _choose_cols(n):
    """Widest lane-dense last dim that divides n (prefer >= 8 rows)."""
    for c in (2048, 1024, 512, 256, 128):
        if n % c == 0 and n // c >= _SUBLANE:
            return c
    for c in (2048, 1024, 512, 256, 128):
        if n % c == 0:
            return c
    return None


def _swish_2d(x2d):
    """Run the tiled Pallas kernel over a lane-dense 2D slab."""
    rows, cols = x2d.shape
    dtype = x2d.dtype
    itemsize = jnp.dtype(dtype).itemsize
    # Sublane packing: block_rows must be a multiple of 8 (f32) / 16 (bf16) /
    # 32 (1-byte dtypes), or equal the full dim.
    sub = max(_SUBLANE, 32 // max(itemsize, 1))

    block_rows = max(sub, (_target_block_bytes() // (cols * itemsize)) // sub * sub)

    # Pipeline shaping: keep >= _MIN_GRID_STEPS grid steps whenever the slab
    # is big enough, so DMA in / compute / DMA out overlap and v7x's two
    # TensorCores both get work on the "parallel" axis.
    if rows >= _MIN_GRID_STEPS * sub:
        cap_rows = max(sub, (rows // _MIN_GRID_STEPS) // sub * sub)
        block_rows = min(block_rows, cap_rows)
    if block_rows >= rows:
        block_rows = rows  # tiny slab: single full-extent block

    grid = (pl.cdiv(rows, block_rows),)

    return pl.pallas_call(
        _swish_kernel,
        out_shape=jax.ShapeDtypeStruct((rows, cols), dtype),
        grid_spec=pl.GridSpec(
            grid=grid,
            in_specs=[pl.BlockSpec((block_rows, cols), lambda i: (i, 0))],
            out_specs=pl.BlockSpec((block_rows, cols), lambda i: (i, 0)),
        ),
        compiler_params=pltpu.CompilerParams(
            dimension_semantics=("parallel",),
            vmem_limit_bytes=_VMEM_LIMIT_BYTES,
        ),
    )(x2d)


def swish(x):
    """Elementwise Swish on an arbitrary-shape float array via Pallas."""
    orig_shape = x.shape
    orig_dtype = x.dtype
    if not jnp.issubdtype(orig_dtype, jnp.floating):
        raise TypeError(f"Swish expects a floating dtype, got {orig_dtype}")

    n = x.size
    if n == 0:
        return x
    if n < _LANE:
        # Too small for a kernel launch to be worth it.
        return x * jax.nn.sigmoid(x)

    cols = _choose_cols(n)
    if cols is not None:
        # Fast path: size is 128-aligned -> reshape straight into a
        # lane-dense 2D slab, run, reshape back. No padding, no extra traffic.
        out2d = _swish_2d(x.reshape(n // cols, cols))
        return out2d.reshape(orig_shape)

    # Unaligned path: run the kernel over the 128-aligned prefix and handle
    # the (<128-element) tail with plain XLA. One concat instead of the old
    # pad + slice round trips.
    # TODO(synk): mask the tail inside the kernel (scalar-prefetched n +
    # iota mask + masked store) to avoid even the concat copy.
    flat = x.reshape(-1)
    n_main = (n // _LANE) * _LANE
    main = flat[:n_main]
    tail = flat[n_main:]

    main_cols = _choose_cols(n_main)  # always succeeds (n_main % 128 == 0)
    main_out = _swish_2d(main.reshape(n_main // main_cols, main_cols)).reshape(-1)
    tail_out = (tail * jax.nn.sigmoid(tail)).astype(orig_dtype)

    return jnp.concatenate([main_out, tail_out]).reshape(orig_shape)


if __name__ == "__main__":
    key = jax.random.PRNGKey(0)
    # Small NCHW input consistent with typical conv-activation usage.
    x = jax.random.normal(key, (2, 4, 16, 16), dtype=jnp.float32)

    out = jax.block_until_ready(swish(x))

    # Reference check in plain JAX.
    ref = x * jax.nn.sigmoid(x)
    assert out.shape == x.shape and out.dtype == x.dtype
    assert jnp.max(jnp.abs(out - ref)) < 1e-5

    # Also exercise the unaligned (prefix + tail) path.
    x2 = jax.random.normal(jax.random.PRNGKey(1), (3, 5, 7, 11), dtype=jnp.float32)
    out2 = jax.block_until_ready(swish(x2))
    ref2 = x2 * jax.nn.sigmoid(x2)
    assert out2.shape == x2.shape and out2.dtype == x2.dtype
    assert jnp.max(jnp.abs(out2 - ref2)) < 1e-5

    print("KERNEL_OK")
</pallas_src>

<mosaic_0001>
module attributes {stable_mosaic.version = 11 : i64} {
  func.func @_swish_kernel(%arg0: i32, %arg1: memref<8x256xf32, #tpu.memory_space<vmem>>, %arg2: memref<8x256xf32, #tpu.memory_space<vmem>>) attributes {dimension_semantics = [#tpu.dimension_semantics<parallel>], iteration_bounds = array<i64: 1>, scalar_prefetch = 0 : i64, scratch_operands = 0 : i64, tpu.core_type = #tpu.core_type<tc>, window_params = [{transform_indices = @transform_0, window_bounds = array<i64: 8, 256>}, {transform_indices = @transform_1, window_bounds = array<i64: 8, 256>}]} {
    %c0 = arith.constant 0 : index
    %c0_0 = arith.constant 0 : index
    %0 = vector.load %arg1[%c0, %c0_0] : memref<8x256xf32, #tpu.memory_space<vmem>>, vector<8x256xf32>
    %1 = arith.negf %0 : vector<8x256xf32>
    %2 = math.exp %1 : vector<8x256xf32>
    %cst = arith.constant 1.000000e+00 : f32
    %3 = vector.broadcast %cst : f32 to vector<8x256xf32>
    %4 = arith.addf %3, %2 : vector<8x256xf32>
    %5 = arith.divf %3, %4 : vector<8x256xf32>
    %6 = arith.mulf %0, %5 : vector<8x256xf32>
    %c0_1 = arith.constant 0 : index
    %c0_2 = arith.constant 0 : index
    %7 = vector.load %arg2[%c0_1, %c0_2] : memref<8x256xf32, #tpu.memory_space<vmem>>, vector<8x256xf32>
    tpu.vector_store %arg2[%c0_1, %c0_2], %6 {strides = array<i32>} : memref<8x256xf32, #tpu.memory_space<vmem>>, vector<8x256xf32>,
    return
  }
  func.func @transform_0(%arg0: i32) -> (i32, i32) {
    %c0_i32 = arith.constant 0 : i32
    %c0_i32_0 = arith.constant 0 : i32
    return %arg0, %c0_i32 : i32, i32
  }
  func.func @transform_1(%arg0: i32) -> (i32, i32) {
    %c0_i32 = arith.constant 0 : i32
    %c0_i32_0 = arith.constant 0 : i32
    return %arg0, %c0_i32 : i32, i32
  }
}

</mosaic_0001>

<bundles_post_ra>
// kernel: tpu_custom_call.1
= control target key start
LH: loop header
LB: loop body
LE: loop exit
PB: predicated region body
PF: predicated region fallthrough
CT: control target
= control target key end

     0   :  { %6 = vsyncpa [#allocation3], 0  ;;  %s128_s0 = inlined_call_operand.hbm [shape: f32[8,256], index: 0, kind: input, shape index: {}]   ;;  %s129_s1 = inlined_call_operand.hbm [shape: f32[8,256], index: 1, kind: output, shape index: {}]  }
   0x1   :  { %7 = vsyncpa [#allocation4], 0  ;;  %s110_s6 = smov [#allocation2]  }
   0x2   :  { %s14_s7 = sshll.u32 %s110_s6, 4  ;;  %s15_s7 = int_to_ptr.vmem [resolvable:$true] %s14_s7 }
   0x3   :  { %s74_s8 = scalar_lea.vmem %s15_s7, 256  ;;  %p79_p1 = scmp.lt.s32.totalorder %s15_s7, %s15_s7 }
   0x4   :  { %p75_p0 = scmp.ne.s32.totalorder %s15_s7, %s74_s8  ;;  %p80_p2 = scmp.lt.s32.totalorder %s74_s8, %s74_s8 }
   0x6   :  { %p81_p3 = por %p80_p2, %p79_p1 }
   0x8   :  { %p82_p4 = pnand %p81_p3, %p75_p0 }
   0xa   :  { %85 = shalt.err (!%p82_p4)
}
   0xb   :  { %17 = dma.hbm_to_vmem [thread:$0]  %s128_s0, 256, %s15_s7, [#allocation3]  }
   0xc   :  { %106 = dma.done.wait [#allocation3], 256  }
   0xd   :  { %107 = vsyncadd [#allocation3], 4294967040  ;;  %v21_v0 = vld [vmem:[#allocation2] sm:$0xff]  ;;  %v22_v1 = vld [vmem:[#allocation2 + $0x8] sm:$0xff]  ;;  %s111_s11 = smov [#allocation5]  }
   0xe   :  { %v54_v2 = vmul.f32 -1.442695, %v21_v0  ;;  %v55_v3 = vmul.f32 -1.442695, %v22_v1  ;;  %s45_s12 = sshll.u32 %s111_s11, 4  ;;  %s46_s12 = int_to_ptr.vmem [resolvable:$true] %s45_s12 }
   0xf   :  { %s86_s0 = scalar_lea.vmem %s46_s12, 256  ;;  %p91_p6 = scmp.lt.s32.totalorder %s46_s12, %s46_s12 }
  0x10   :  { %58 = vpow2.f32 %v54_v2  ;;  %p87_p5 = scmp.ne.s32.totalorder %s46_s12, %s86_s0  ;;  %p92_p7 = scmp.lt.s32.totalorder %s86_s0, %s86_s0 }
  0x11   :  { %60 = vpow2.f32 %v55_v3 }
  0x12   :  { %p93_p8 = por %p92_p7, %p91_p6 }
  0x14   :  { %p94_p9 = pnand %p93_p8, %p87_p5 }
  0x1d   :  { %v59_v4 = vpop.eup %58 }
  0x1e   :  { %v61_v5 = vpop.eup %60  ;;  %v29_v6 = vadd.f32 1.0, %v59_v4 }
  0x1f   :  { %v30_v7 = vadd.f32 1.0, %v61_v5 }
  0x20   :  { %62 = vrcp.f32 %v29_v6 }
  0x21   :  { %64 = vrcp.f32 %v30_v7 }
  0x2d   :  { %v63_v8 = vpop.eup %62 }
  0x2e   :  { %v65_v9 = vpop.eup %64  ;;  %v35_v10 = vmul.f32 %v63_v8, %v21_v0 }
  0x2f   :  { %v36_v11 = vmul.f32 %v65_v9, %v22_v1 }
  0x30   :  { %37 = vst [vmem:[#allocation5] sm:$0xff] %v35_v10 }
  0x31   :  { %38 = vst [vmem:[#allocation5 + $0x8] sm:$0xff] %v36_v11 }
  0x32   :  { %97 = shalt.err (!%p94_p9)
}
  0x33   :  { %48 = dma.vmem_to_hbm [thread:$0]  %s46_s12, 256, %s129_s1, [#allocation4]  }
  0x34   :  { %108 = dma.done.wait [#allocation4], 256  }
  0x35   :  { %109 = vsyncadd [#allocation4], 4294967040 }
  0x36   :  { %52 = vsyncpa [#allocation3], 1 }
  0x37   :  { %53 = vsyncpa [#allocation4], 1 }

</bundles_post_ra>
